<compile_context>
chip_gen: v6e
topology: v6e:2x2x1
jax: 0.10.0
libtpu: 0.0.40
codegen_flags: <defaults>
</compile_context>

<pallas_src>
import functools

import jax
import jax.numpy as jnp
import numpy as np
from jax.experimental import pallas as pl
from jax.experimental.pallas import tpu as pltpu

_INV_SQRT2 = 0.7071067811865476


def _ffn_kernel(x_ref, w1_ref, b1_ref, w2_ref, b2_ref, o_ref, *scratch):
    """One (TM, E) row tile x one TH-slice of the hidden dim.

    fc1 slice -> exact GELU (f32) -> partial fc2, accumulated in f32.
    When the output dtype is f32, the output block itself (resident across the
    h axis via index_map (i, 0)) is the accumulator and no scratch is used.
    """
    acc_ref = scratch[0] if scratch else o_ref
    h_idx = pl.program_id(1)

    @pl.when(h_idx == 0)
    def _():
        acc_ref[...] = jnp.zeros_like(acc_ref)

    # fc1 slice: (TM, E) @ (E, TH) in native dtype, f32 accumulation on the MXU.
    h = jnp.dot(x_ref[...], w1_ref[...], preferred_element_type=jnp.float32)
    h = h + b1_ref[...].astype(jnp.float32)

    # Exact GELU (PyTorch nn.GELU default): 0.5 * h * (1 + erf(h / sqrt(2))).
    # NOTE: erf lowers to a VPU polynomial (not an EUP op); it stays hidden
    # while the MXU is the binding unit.
    h = 0.5 * h * (1.0 + jax.lax.erf(h * jnp.float32(_INV_SQRT2)))

    # Partial fc2: (TM, TH) @ (TH, E), accumulated in f32.  Activation is cast
    # once to the weight dtype (bf16 fast path when weights are bf16).
    acc_ref[...] += jnp.dot(h.astype(w2_ref.dtype), w2_ref[...],
                            preferred_element_type=jnp.float32)

    @pl.when(h_idx == pl.num_programs(1) - 1)
    def _():
        o_ref[...] = (acc_ref[...] + b2_ref[...].astype(jnp.float32)).astype(o_ref.dtype)


def _round_up(a, b):
    return (a + b - 1) // b * b


def _vmem_capacity_bytes():
    try:
        cap = getattr(pltpu.get_tpu_info(), "vmem_capacity_bytes", None)
        if cap:
            return int(cap)
    except Exception:
        pass
    return 64 * 1024 * 1024  # conservative fallback: v7x physical per-TC VMEM


def _choose_hidden_tile(H, block_hidden):
    """Largest MXU-aligned (256 preferred, else 128) divisor of H <= block_hidden."""
    for align in (256, 128):
        th = (min(block_hidden, H) // align) * align
        while th >= align:
            if H % th == 0:
                return th
            th -= align
    return H  # tiny H (< 128): keep the whole hidden dim


def _choose_row_tile(n, block_rows, min_rows):
    """Largest row tile <= block_rows keeping padding waste <= ~12.5%."""
    if n <= block_rows:
        return _round_up(n, min_rows)
    tm = block_rows
    while tm > 128:
        if (_round_up(n, tm) - n) * 8 <= n:
            return tm
        tm //= 2
    return max(tm, min_rows)


def _vmem_block_bytes(tm, th, E, x_bytes, w_bytes, out_bytes, use_scratch):
    # Double-buffered input/output blocks + (optional) f32 accumulator scratch.
    two_buf = 2 * (tm * E * x_bytes          # x row tile
                   + E * th * w_bytes        # w1 TH-slice
                   + th * E * w_bytes        # w2 TH-slice
                   + th * w_bytes            # b1 TH-slice
                   + E * w_bytes             # b2
                   + tm * E * out_bytes)     # out row tile
    return two_buf + (tm * E * 4 if use_scratch else 0)


@functools.partial(jax.jit,
                   static_argnames=("block_rows", "block_hidden", "compute_dtype"))
def feed_forward(x, w1, b1, w2, b2, *, block_rows=512, block_hidden=2048,
                 compute_dtype=None):
    """FeedForward: GELU(x @ w1 + b1) @ w2 + b2 ; dropout = identity (eval mode).

    x: (B, S, E).  w1: (E, 4E), b1: (4E,), w2: (4E, E), b2: (E,)  (weights stored
    as (in, out), i.e. nn.Linear.weight.T).
    compute_dtype: optionally cast x/w1/w2 (e.g. jnp.bfloat16) for the MXU fast
    path; accumulation stays f32 and the output keeps x's original dtype.
    """
    out_dtype = x.dtype
    if compute_dtype is not None:
        x = x.astype(compute_dtype)
        w1 = w1.astype(compute_dtype)
        w2 = w2.astype(compute_dtype)

    B, S, E = x.shape
    H = w1.shape[1]
    N = B * S

    x_bytes = np.dtype(x.dtype).itemsize
    w_bytes = np.dtype(w1.dtype).itemsize
    o_bytes = np.dtype(out_dtype).itemsize
    min_rows = max(8, 32 // x_bytes)          # sublane tile per dtype (f32:8, bf16:16)

    use_scratch = out_dtype != jnp.float32    # f32 output accumulates in-place

    # VMEM limit derived per-generation with headroom (v7x ~54 MiB, v6e/v5e ~108 MiB).
    vmem_cap = _vmem_capacity_bytes()
    vmem_limit = min(int(vmem_cap * 0.85), vmem_cap - 8 * 1024 * 1024)
    budget = int(vmem_limit * 0.80)           # slack for compiler-internal scratch

    # Tile selection: big TM amortizes weight streaming; TH divides H (aligned).
    tm = _choose_row_tile(N, block_rows, min_rows)
    th = _choose_hidden_tile(H, block_hidden)
    while _vmem_block_bytes(tm, th, E, x_bytes, w_bytes, o_bytes, use_scratch) > budget:
        if th > 128:
            new_th = _choose_hidden_tile(H, th // 2)
            if new_th < th:
                th = new_th
                continue
        if tm > max(min_rows, 128):
            tm = max(min_rows, _round_up(tm // 2, min_rows))
            continue
        break  # best effort; remaining config is small anyway

    # Megacore: avoid a single row tile leaving one TensorCore idle, but never
    # split below 256-row halves.
    n_pad = _round_up(N, tm)
    if n_pad // tm < 2 and tm >= 512:
        tm = _round_up(tm // 2, min_rows)
        n_pad = _round_up(N, tm)

    x2d = x.reshape(N, E)
    if n_pad != N:
        x2d = jnp.pad(x2d, ((0, n_pad - N), (0, 0)))
    b1_2d = b1.reshape(1, H)
    b2_2d = b2.reshape(1, E)

    row_tiles = n_pad // tm
    grid = (row_tiles, H // th)

    cost = pl.CostEstimate(
        flops=4 * N * E * H,                           # two matmuls
        transcendentals=N * H,                         # erf per hidden activation
        bytes_accessed=(N * E * x_bytes + N * E * o_bytes        # x in, y out
                        + 2 * E * H * w_bytes * row_tiles        # weights per row tile
                        + (H + E) * w_bytes * row_tiles),        # biases per row tile
    )

    scratch_shapes = (pltpu.VMEM((tm, E), jnp.float32),) if use_scratch else ()

    out2d = pl.pallas_call(
        _ffn_kernel,
        out_shape=jax.ShapeDtypeStruct((n_pad, E), out_dtype),
        grid_spec=pltpu.PrefetchScalarGridSpec(
            num_scalar_prefetch=0,
            grid=grid,
            in_specs=[
                pl.BlockSpec((tm, E), lambda i, h: (i, 0)),    # x row tile
                pl.BlockSpec((E, th), lambda i, h: (0, h)),    # w1 TH-slice
                pl.BlockSpec((1, th), lambda i, h: (0, h)),    # b1 TH-slice
                pl.BlockSpec((th, E), lambda i, h: (h, 0)),    # w2 TH-slice
                pl.BlockSpec((1, E), lambda i, h: (0, 0)),     # b2
            ],
            out_specs=pl.BlockSpec((tm, E), lambda i, h: (i, 0)),
            scratch_shapes=scratch_shapes,
        ),
        compiler_params=pltpu.CompilerParams(
            dimension_semantics=("parallel", "arbitrary"),
            vmem_limit_bytes=vmem_limit,
        ),
        cost_estimate=cost,
    )(x2d, w1, b1_2d, w2, b2_2d)

    if n_pad != N:
        out2d = out2d[:N]
    return out2d.reshape(B, S, E)


def _reference(x, w1, b1, w2, b2):
    h = jnp.dot(x, w1) + b1
    h = 0.5 * h * (1.0 + jax.lax.erf(h / jnp.sqrt(jnp.float32(2.0))))
    return jnp.dot(h, w2) + b2


if __name__ == "__main__":
    # Small config: batch=2, seq=8, n_embedding=32  ->  hidden = 4*32 = 128
    B, S, E = 2, 8, 32
    H = 4 * E

    key = jax.random.PRNGKey(0)
    kx, k1, kb1, k2, kb2 = jax.random.split(key, 5)

    x = jax.random.normal(kx, (B, S, E), dtype=jnp.float32)
    # Params match nn.Linear(E, 4E) / nn.Linear(4E, E), stored as (in, out) == weight.T.
    w1 = jax.random.normal(k1, (E, H), dtype=jnp.float32) * (1.0 / jnp.sqrt(E))
    b1 = jax.random.normal(kb1, (H,), dtype=jnp.float32) * 0.01
    w2 = jax.random.normal(k2, (H, E), dtype=jnp.float32) * (1.0 / jnp.sqrt(H))
    b2 = jax.random.normal(kb2, (E,), dtype=jnp.float32) * 0.01

    ref = _reference(x, w1, b1, w2, b2)

    # Native f32 path: must match the exact reference tightly.
    out = feed_forward(x, w1, b1, w2, b2)
    out = jax.block_until_ready(out)
    assert out.shape == (B, S, E)
    assert jnp.allclose(out, ref, atol=1e-4, rtol=1e-4), "f32 mismatch vs reference"

    # bf16 MXU fast path (f32 accumulation, f32 output): loose tolerance.
    out_bf16 = feed_forward(x, w1, b1, w2, b2, compute_dtype=jnp.bfloat16)
    out_bf16 = jax.block_until_ready(out_bf16)
    assert out_bf16.shape == (B, S, E)
    assert bool(jnp.all(jnp.isfinite(out_bf16)))
    assert jnp.allclose(out_bf16, ref, atol=0.25, rtol=0.05), "bf16 path diverged"

    print("KERNEL_OK")
</pallas_src>

<mosaic_0001>
module attributes {stable_mosaic.version = 11 : i64} {
  func.func @_ffn_kernel(%arg0: i32, %arg1: i32, %arg2: memref<16x32xf32, #tpu.memory_space<vmem>>, %arg3: memref<32x128xf32, #tpu.memory_space<vmem>>, %arg4: memref<1x128xf32, #tpu.memory_space<vmem>>, %arg5: memref<128x32xf32, #tpu.memory_space<vmem>>, %arg6: memref<1x32xf32, #tpu.memory_space<vmem>>, %arg7: memref<16x32xf32, #tpu.memory_space<vmem>>) attributes {dimension_semantics = [#tpu.dimension_semantics<parallel>, #tpu.dimension_semantics<arbitrary>], iteration_bounds = array<i64: 1, 1>, scalar_prefetch = 0 : i64, scratch_operands = 0 : i64, tpu.core_type = #tpu.core_type<tc>, window_params = [{transform_indices = @transform_0, window_bounds = array<i64: 16, 32>}, {transform_indices = @transform_1, window_bounds = array<i64: 32, 128>}, {transform_indices = @transform_2, window_bounds = array<i64: 1, 128>}, {transform_indices = @transform_3, window_bounds = array<i64: 128, 32>}, {pipeline_mode = #tpu.pipeline_mode<synchronous>, transform_indices = @transform_4, window_bounds = array<i64: 1, 32>}, {transform_indices = @transform_5, window_bounds = array<i64: 16, 32>}]} {
    %c0_i32 = arith.constant 0 : i32
    %0 = arith.cmpi eq, %arg1, %c0_i32 : i32
    %1 = arith.extui %0 : i1 to i32
    %c0_i32_0 = arith.constant 0 : i32
    %2 = arith.cmpi ne, %1, %c0_i32_0 : i32
    scf.if %2 {
      %cst_18 = arith.constant 0.000000e+00 : f32
      %25 = vector.broadcast %cst_18 : f32 to vector<16x32xf32>
      %c0_19 = arith.constant 0 : index
      %c0_20 = arith.constant 0 : index
      %26 = vector.load %arg7[%c0_19, %c0_20] : memref<16x32xf32, #tpu.memory_space<vmem>>, vector<16x32xf32>
      tpu.vector_store %arg7[%c0_19, %c0_20], %25 {strides = array<i32>} : memref<16x32xf32, #tpu.memory_space<vmem>>, vector<16x32xf32>,
    } else {
    }
    %c0 = arith.constant 0 : index
    %c0_1 = arith.constant 0 : index
    %3 = vector.load %arg2[%c0, %c0_1] : memref<16x32xf32, #tpu.memory_space<vmem>>, vector<16x32xf32>
    %c0_2 = arith.constant 0 : index
    %c0_3 = arith.constant 0 : index
    %4 = vector.load %arg3[%c0_2, %c0_3] : memref<32x128xf32, #tpu.memory_space<vmem>>, vector<32x128xf32>
    %cst = arith.constant dense<0.000000e+00> : vector<16x128xf32>
    %5 = tpu.matmul %3, %4, %cst {dimension_numbers = #tpu.dot_dimension_numbers<[1], [0], [0], [1], [0, 0, 1, 1], [], []>} : vector<16x32xf32>, vector<32x128xf32>, vector<16x128xf32> -> vector<16x128xf32>
    %c0_4 = arith.constant 0 : index
    %c0_5 = arith.constant 0 : index
    %6 = vector.load %arg4[%c0_4, %c0_5] : memref<1x128xf32, #tpu.memory_space<vmem>>, vector<1x128xf32>
    %7 = vector.broadcast %6 : vector<1x128xf32> to vector<16x128xf32>
    %8 = arith.addf %5, %7 : vector<16x128xf32>
    %cst_6 = arith.constant 5.000000e-01 : f32
    %9 = vector.broadcast %cst_6 : f32 to vector<16x128xf32>
    %10 = arith.mulf %9, %8 : vector<16x128xf32>
    %cst_7 = arith.constant 0.707106769 : f32
    %11 = vector.broadcast %cst_7 : f32 to vector<16x128xf32>
    %12 = arith.mulf %8, %11 : vector<16x128xf32>
    %13 = math.erf %12 : vector<16x128xf32>
    %cst_8 = arith.constant 1.000000e+00 : f32
    %14 = vector.broadcast %cst_8 : f32 to vector<16x128xf32>
    %15 = arith.addf %14, %13 : vector<16x128xf32>
    %16 = arith.mulf %10, %15 : vector<16x128xf32>
    %c0_9 = arith.constant 0 : index
    %c0_10 = arith.constant 0 : index
    %17 = vector.load %arg7[%c0_9, %c0_10] : memref<16x32xf32, #tpu.memory_space<vmem>>, vector<16x32xf32>
    %c0_11 = arith.constant 0 : index
    %c0_12 = arith.constant 0 : index
    %18 = vector.load %arg5[%c0_11, %c0_12] : memref<128x32xf32, #tpu.memory_space<vmem>>, vector<128x32xf32>
    %cst_13 = arith.constant dense<0.000000e+00> : vector<16x32xf32>
    %19 = tpu.matmul %16, %18, %cst_13 {dimension_numbers = #tpu.dot_dimension_numbers<[1], [0], [0], [1], [0, 0, 1, 1], [], []>} : vector<16x128xf32>, vector<128x32xf32>, vector<16x32xf32> -> vector<16x32xf32>
    %20 = arith.addf %17, %19 : vector<16x32xf32>
    %c0_14 = arith.constant 0 : index
    %c0_15 = arith.constant 0 : index
    %21 = vector.load %arg7[%c0_14, %c0_15] : memref<16x32xf32, #tpu.memory_space<vmem>>, vector<16x32xf32>
    tpu.vector_store %arg7[%c0_14, %c0_15], %20 {strides = array<i32>} : memref<16x32xf32, #tpu.memory_space<vmem>>, vector<16x32xf32>,
    %c0_i32_16 = arith.constant 0 : i32
    %22 = arith.cmpi eq, %arg1, %c0_i32_16 : i32
    %23 = arith.extui %22 : i1 to i32
    %c0_i32_17 = arith.constant 0 : i32
    %24 = arith.cmpi ne, %23, %c0_i32_17 : i32
    scf.if %24 {
      %c0_18 = arith.constant 0 : index
      %c0_19 = arith.constant 0 : index
      %25 = vector.load %arg7[%c0_18, %c0_19] : memref<16x32xf32, #tpu.memory_space<vmem>>, vector<16x32xf32>
      %c0_20 = arith.constant 0 : index
      %c0_21 = arith.constant 0 : index
      %26 = vector.load %arg6[%c0_20, %c0_21] : memref<1x32xf32, #tpu.memory_space<vmem>>, vector<1x32xf32>
      %27 = vector.broadcast %26 : vector<1x32xf32> to vector<16x32xf32>
      %28 = arith.addf %25, %27 : vector<16x32xf32>
      %c0_22 = arith.constant 0 : index
      %c0_23 = arith.constant 0 : index
      %29 = vector.load %arg7[%c0_22, %c0_23] : memref<16x32xf32, #tpu.memory_space<vmem>>, vector<16x32xf32>
      tpu.vector_store %arg7[%c0_22, %c0_23], %28 {strides = array<i32>} : memref<16x32xf32, #tpu.memory_space<vmem>>, vector<16x32xf32>,
    } else {
    }
    return
  }
  func.func @transform_0(%arg0: i32, %arg1: i32) -> (i32, i32) {
    %c0_i32 = arith.constant 0 : i32
    %c0_i32_0 = arith.constant 0 : i32
    return %arg0, %c0_i32 : i32, i32
  }
  func.func @transform_1(%arg0: i32, %arg1: i32) -> (i32, i32) {
    %c0_i32 = arith.constant 0 : i32
    %c0_i32_0 = arith.constant 0 : i32
    return %c0_i32, %arg1 : i32, i32
  }
  func.func @transform_2(%arg0: i32, %arg1: i32) -> (i32, i32) {
    %c0_i32 = arith.constant 0 : i32
    %c0_i32_0 = arith.constant 0 : i32
    return %c0_i32, %arg1 : i32, i32
  }
  func.func @transform_3(%arg0: i32, %arg1: i32) -> (i32, i32) {
    %c0_i32 = arith.constant 0 : i32
    %c0_i32_0 = arith.constant 0 : i32
    return %arg1, %c0_i32 : i32, i32
  }
  func.func @transform_4(%arg0: i32, %arg1: i32) -> (i32, i32) {
    %c0_i32 = arith.constant 0 : i32
    %c0_i32_0 = arith.constant 0 : i32
    %c0_i32_1 = arith.constant 0 : i32
    return %c0_i32, %c0_i32_0 : i32, i32
  }
  func.func @transform_5(%arg0: i32, %arg1: i32) -> (i32, i32) {
    %c0_i32 = arith.constant 0 : i32
    %c0_i32_0 = arith.constant 0 : i32
    return %arg0, %c0_i32 : i32, i32
  }
}

</mosaic_0001>

<bundles_post_ra>
// kernel: feed_forward.1
= control target key start
LH: loop header
LB: loop body
LE: loop exit
PB: predicated region body
PF: predicated region fallthrough
CT: control target
= control target key end

     0   :  { %vm25_vm0 = vcmask 261120   ;;  %s483_s0 = inlined_call_operand.vmem [shape: f32[16,32], index: 0, kind: input, shape index: {}]   ;;  %s484_s1 = inlined_call_operand.vmem [shape: f32[32,128], index: 1, kind: input, shape index: {}]   ;;  %s485_s2 = inlined_call_operand.vmem [shape: f32[1,128], index: 2, kind: input, shape index: {}]   ;;  %s486_s3 = inlined_call_operand.vmem [shape: f32[128,32], index: 3, kind: input, shape index: {}]   ;;  %s487_s4 = inlined_call_operand.vmem [shape: f32[1,32], index: 4, kind: input, shape index: {}]   ;;  %s488_s5 = inlined_call_operand.hbm [shape: f32[16,32], index: 5, kind: output, shape index: {}]  }
   0x1   :  { %v33_v0 = vld [vmem:[%s484_s1 + $0x18] sm:$0xff]  ;;  %v32_v1 = vld [vmem:[%s484_s1 + $0x10] sm:$0xff]  ;;  %v28_v2 = vld [vmem:[%s483_s0] sm:$0xff] }
   0x2   :  { %290 = vmatprep.subr.mxu0 %v33_v0  ;;  %v31_v3 = vld [vmem:[%s484_s1 + $0x8] sm:$0xff]  ;;  %298 = vmatprep.mubr.msk.f32.mxu0 %vm25_vm0, %v28_v2  ;;  %v150_v4 = vld [vmem:[%s486_s3 + $0x78] sm:$0xff]  ;;  %v149_v5 = vld [vmem:[%s486_s3 + $0x70] sm:$0xff] }
   0x3   :  { %291 = vmatpush3.msra.mxu0 %v33_v0  ;;  %301 = vmatprep.subr.mxu1 %v150_v4 }
   0x4   :  { %292 = vmatprep.subr.mxu0 %v32_v1 }
   0x5   :  { %10 = vsyncpa [#allocation3], 0  ;;  %293 = vmatpush3.msra.mxu0 %v32_v1  ;;  %v30_v6 = vld [vmem:[%s484_s1] sm:$0xff]  ;;  %302 = vmatpush3.msra.mxu1 %v150_v4  ;;  %v148_v7 = vld [vmem:[%s486_s3 + $0x68] sm:$0xff]  ;;  %v366_v22 = vmov 0.0   ;;  %s367_s11 = smov [#allocation2]  }
   0x6   :  { %294 = vmatprep.subr.mxu0 %v31_v3  ;;  %303 = vmatprep.subr.mxu1 %v149_v5  ;;  %v29_v8 = vld [vmem:[%s483_s0 + $0x8] sm:$0xff]  ;;  %v147_v9 = vld [vmem:[%s486_s3 + $0x60] sm:$0xff]  ;;  %v146_v10 = vld [vmem:[%s486_s3 + $0x58] sm:$0xff]  ;;  %27 = vst.msk [vmem:[#allocation2 + $0x8] sm:$0xff] %vm25_vm0, %v366_v22  ;;  %s251_s12 = sshll.u32 %s367_s11, 4  ;;  %s252_s12 = int_to_ptr.vmem [resolvable:$true] %s251_s12 }
   0x7   :  { %295 = vmatpush3.msra.mxu0 %v31_v3  ;;  %304 = vmatpush3.msra.mxu1 %v149_v5  ;;  %v145_v11 = vld [vmem:[%s486_s3 + $0x50] sm:$0xff]  ;;  %v144_v12 = vld [vmem:[%s486_s3 + $0x48] sm:$0xff]  ;;  %v143_v13 = vld [vmem:[%s486_s3 + $0x40] sm:$0xff]  ;;  %26 = vst.msk [vmem:[#allocation2] sm:$0xff] %vm25_vm0, %v366_v22  ;;  %s344_s13 = scalar_lea.vmem %s252_s12, 256  ;;  %p349_p1 = scmp.lt.s32.totalorder %s252_s12, %s252_s12 }
   0x8   :  { %296 = vmatprep.subr.mxu0 %v30_v6  ;;  %305 = vmatprep.subr.mxu1 %v148_v7  ;;  %v142_v14 = vld [vmem:[%s486_s3 + $0x38] sm:$0xff]  ;;  %v141_v15 = vld [vmem:[%s486_s3 + $0x30] sm:$0xff]  ;;  %v140_v16 = vld [vmem:[%s486_s3 + $0x28] sm:$0xff]  ;;  %p345_p0 = scmp.ne.s32.totalorder %s252_s12, %s344_s13  ;;  %p350_p2 = scmp.lt.s32.totalorder %s344_s13, %s344_s13 }
   0x9   :  { %297 = vmatpush3.msra.mxu0 %v30_v6  ;;  %306 = vmatpush3.msra.mxu1 %v148_v7  ;;  %v139_v17 = vld [vmem:[%s486_s3 + $0x20] sm:$0xff]  ;;  %v138_v18 = vld [vmem:[%s486_s3 + $0x18] sm:$0xff]  ;;  %v137_v19 = vld [vmem:[%s486_s3 + $0x10] sm:$0xff] }
   0xa   :  { %299 = vmatmul.mubr.msk.f32.vlgmr.msra.gmra.mxu0 %vm25_vm0, %v29_v8  ;;  %307 = vmatprep.subr.mxu1 %v147_v9  ;;  %v136_v20 = vld [vmem:[%s486_s3 + $0x8] sm:$0xff]  ;;  %v135_v21 = vld [vmem:[%s486_s3] sm:$0xff]  ;;  %p351_p3 = por %p350_p2, %p349_p1 }
   0xb   :  { %308 = vmatpush3.msra.mxu1 %v147_v9  ;;  %v262_v23 = vld [vmem:[%s485_s2] ss:$0 sm:$0xff] }
   0xc   :  { %309 = vmatprep.subr.mxu1 %v146_v10  ;;  %v265_v44 = vld [vmem:[%s487_s4] ss:$0 sm:$0xff]  ;;  %p352_p4 = pnand %p351_p3, %p345_p0 }
   0xd   :  { %310 = vmatpush3.msra.mxu1 %v146_v10  ;;  %v134_v38 = vld [vmem:[#allocation2 + $0x8] sm:$0xff] }
   0xe   :  { %311 = vmatprep.subr.mxu1 %v145_v11  ;;  %v133_v40 = vld [vmem:[#allocation2] sm:$0xff] }
   0xf   :  { %312 = vmatpush3.msra.mxu1 %v145_v11 }
  0x10   :  { %313 = vmatprep.subr.mxu1 %v144_v12 }
  0x11   :  { %314 = vmatpush3.msra.mxu1 %v144_v12 }
  0x12   :  { %315 = vmatprep.subr.mxu1 %v143_v13 }
  0x13   :  { %316 = vmatpush3.msra.mxu1 %v143_v13 }
  0x14   :  { %317 = vmatprep.subr.mxu1 %v142_v14 }
  0x15   :  { %318 = vmatpush3.msra.mxu1 %v142_v14 }
  0x16   :  { %319 = vmatprep.subr.mxu1 %v141_v15 }
  0x17   :  { %320 = vmatpush3.msra.mxu1 %v141_v15 }
  0x18   :  { %321 = vmatprep.subr.mxu1 %v140_v16 }
  0x19   :  { %322 = vmatpush3.msra.mxu1 %v140_v16 }
  0x1a   :  { %323 = vmatprep.subr.mxu1 %v139_v17 }
  0x1b   :  { %324 = vmatpush3.msra.mxu1 %v139_v17 }
  0x1c   :  { %325 = vmatprep.subr.mxu1 %v138_v18 }
  0x1d   :  { %326 = vmatpush3.msra.mxu1 %v138_v18 }
  0x1e   :  { %327 = vmatprep.subr.mxu1 %v137_v19 }
  0x1f   :  { %328 = vmatpush3.msra.mxu1 %v137_v19 }
  0x20   :  { %329 = vmatprep.subr.mxu1 %v136_v20 }
  0x21   :  { %330 = vmatpush3.msra.mxu1 %v136_v20 }
  0x22   :  { %331 = vmatprep.subr.mxu1 %v135_v21 }
  0x23   :  { %332 = vmatpush3.msra.mxu1 %v135_v21 }
  0xca   :  { %v300_v24 = vpop.f32.mrf.mxu0 }
  0xcb   :  { %v120_v25 = vadd.f32 %v300_v24, %v262_v23 }
  0xcc   :  { %v114_v26 = vpop.f32.mrf.mxu0 }
  0xcd   :  { %v126_v27 = vmul.f32 0.70710677, %v120_v25  ;;  %v115_v28 = vadd.f32 %v262_v23, %v114_v26  ;;  %v124_v35 = vmul.f32 0.5, %v120_v25 }
  0xcf   :  { %340 = verf.f32 %v126_v27  ;;  %v125_v29 = vmul.f32 0.70710677, %v115_v28  ;;  %v123_v33 = vmul.f32 0.5, %v115_v28 }
  0xd1   :  { %342 = verf.f32 %v125_v29 }
  0xdc   :  { %v341_v30 = vpop.eup %340 }
  0xdd   :  { %v130_v32 = vadd.f32 1.0, %v341_v30 }
  0xde   :  { %v343_v31 = vpop.eup %342 }
  0xdf   :  { %v129_v34 = vadd.f32 1.0, %v343_v31  ;;  %v132_v37 = vmul.f32 %v130_v32, %v124_v35 }
  0xe1   :  { %v131_v36 = vmul.f32 %v129_v34, %v123_v33 }
  0xe3   :  { %333 = vmatprep.mubr.f32.mxu1 %v131_v36 }
  0xe4   :  { %334 = vmatmul.mubr.f32.vlgmr.msra.gmra.mxu1 %v132_v37 }
 0x1a4   :  { %v335_v39 = vpop.f32.mrf.mxu1 }
 0x1a5   :  { %v227_v41 = vadd.f32 %v335_v39, %v134_v38 }
 0x1a6   :  { %v217_v42 = vpop.f32.mrf.mxu1 }
 0x1a7   :  { %229 = vst.msk [vmem:[#allocation2 + $0x8] sm:$0xff] %vm25_vm0, %v227_v41  ;;  %v226_v43 = vadd.f32 %v217_v42, %v133_v40 }
 0x1a9   :  { %228 = vst.msk [vmem:[#allocation2] sm:$0xff] %vm25_vm0, %v226_v43 }
 0x1ae   :  { %v234_v45 = vld [vmem:[#allocation2 + $0x8] sm:$0xff] }
 0x1af   :  { %v243_v46 = vadd.f32 %v265_v44, %v234_v45 }
 0x1b0   :  { %v233_v47 = vld [vmem:[#allocation2] sm:$0xff] }
 0x1b1   :  { %v242_v48 = vadd.f32 %v265_v44, %v233_v47  ;;  %245 = vst.msk [vmem:[#allocation2 + $0x8] sm:$0xff] %vm25_vm0, %v243_v46 }
 0x1b3   :  { %244 = vst.msk [vmem:[#allocation2] sm:$0xff] %vm25_vm0, %v242_v48 }
 0x1b4   :  { %355 = shalt.err (!%p352_p4)
}
 0x1b5   :  { %s368_s0 = smov 128   ;;  %s369_s4 = smov 8  }
 0x1b6   :  { %257 = dma.vmem_to_hbm [thread:$0]  %s252_s12, 256, %s488_s5, [#allocation3], %s368_s0, %s368_s0, %s369_s4  }
 0x1b7   :  { %364 = dma.done.wait [#allocation3], 256  }
 0x1b8   :  { %365 = vsyncadd [#allocation3], 4294967040 }
 0x1b9   :  { %261 = vsyncpa [#allocation3], 1 }

</bundles_post_ra>
